<compile_context>
chip_gen: v7x
topology: tpu7x:2x2x1
jax: 0.10.0
libtpu: 0.0.40
codegen_flags: <defaults>
</compile_context>

<pallas_src>
import functools

import jax
import jax.numpy as jnp
from jax.experimental import pallas as pl
from jax.experimental.pallas import tpu as pltpu


def _round_up(x, m):
    return ((x + m - 1) // m) * m


def _maxout_kernel(x_ref, w_ref, b_ref, o_ref, acc_ref, *, num_piece, unit_pad):
    """Grid = (batch tiles, D-reduction tiles).

    x_ref:   (tm, tk)             input tile
    w_ref:   (tk, P * unit_pad)   fused piece-major packed weight tile
    b_ref:   (1,  P * unit_pad)   packed bias (f32)
    o_ref:   (tm, unit_pad)       output tile (piece-max), lane-dense
    acc_ref: (tm, P * unit_pad)   f32 VMEM accumulator, resident across k
    """
    k = pl.program_id(1)

    @pl.when(k == 0)
    def _():
        acc_ref[...] = jnp.zeros_like(acc_ref)

    # One fused MXU matmul per (i, k): N = P*unit_pad instead of P small pushes.
    acc_ref[...] += jnp.dot(
        x_ref[...], w_ref[...], preferred_element_type=jnp.float32
    )

    @pl.when(k == pl.num_programs(1) - 1)
    def _():
        # Single bias broadcast in f32, then piece-max over 128-aligned lane slices.
        y = acc_ref[...] + b_ref[...].astype(jnp.float32)
        m = y[:, :unit_pad]
        for p in range(1, num_piece):
            m = jnp.maximum(m, y[:, p * unit_pad:(p + 1) * unit_pad])
        o_ref[...] = m.astype(o_ref.dtype)


def make_maxout(weight, bias, num_piece, num_unit, *,
                compute_dtype=None, block_m=None, block_k=None):
    """Pack torch.nn.Linear-layout params once and return a jitted forward.

    weight: (P*U, D)  (PyTorch Linear layout), bias: (P*U,)
    forward(x): x (B, D) -> (B, U) == linear(x).view(-1, P, U).max(dim=1)[0]
    """
    P, U = num_piece, num_unit
    PU, D = weight.shape
    assert PU == P * U and bias.shape == (PU,)

    out_dtype = weight.dtype
    if compute_dtype is None:
        compute_dtype = weight.dtype

    # ---- Tile / padding choices (all (8, 128)-friendly). ----
    u_pad = _round_up(U, 128)            # lane-aligned piece slabs + dense stores
    n_pad = P * u_pad
    if block_k is None:
        block_k = min(_round_up(D, 128), 512)
    tk = _round_up(block_k, 128)
    d_pad = _round_up(D, tk)

    # ---- Repack parameters ONCE (hoisted out of the per-forward path). ----
    # (P*U, D) -> (P, U, D) -> (D, P, U) -> pad U, D -> (D_pad, P*u_pad).
    w3 = jnp.transpose(weight.reshape(P, U, D), (2, 0, 1))
    w3 = jnp.pad(w3, ((0, d_pad - D), (0, 0), (0, u_pad - U)))
    w_packed = w3.reshape(d_pad, n_pad).astype(compute_dtype)
    b_packed = jnp.pad(bias.reshape(P, U), ((0, 0), (0, u_pad - U)))
    b_packed = b_packed.reshape(1, n_pad).astype(jnp.float32)

    kernel = functools.partial(_maxout_kernel, num_piece=P, unit_pad=u_pad)

    @jax.jit
    def forward(x):
        B, Dx = x.shape
        assert Dx == D
        tm = block_m if block_m is not None else min(_round_up(B, 8), 256)
        tm = _round_up(tm, 8)
        b_pad = _round_up(B, tm)
        x_p = jnp.pad(x, ((0, b_pad - B), (0, d_pad - D))).astype(compute_dtype)

        nb, nk = b_pad // tm, d_pad // tk
        itemsize = jnp.dtype(compute_dtype).itemsize
        cost = pl.CostEstimate(
            flops=2 * b_pad * d_pad * n_pad,
            transcendentals=0,
            bytes_accessed=(b_pad * d_pad + d_pad * n_pad) * itemsize
            + 4 * n_pad + b_pad * u_pad * jnp.dtype(out_dtype).itemsize,
        )

        out = pl.pallas_call(
            kernel,
            out_shape=jax.ShapeDtypeStruct((b_pad, u_pad), out_dtype),
            grid=(nb, nk),
            in_specs=[
                pl.BlockSpec((tm, tk), lambda i, k: (i, k)),
                # Weight / bias blocks depend only on k -> stay VMEM-resident
                # across batch tiles (no re-DMA when only i changes).
                pl.BlockSpec((tk, n_pad), lambda i, k: (k, 0)),
                pl.BlockSpec((1, n_pad), lambda i, k: (0, 0)),
            ],
            out_specs=pl.BlockSpec((tm, u_pad), lambda i, k: (i, 0)),
            scratch_shapes=[pltpu.VMEM((tm, n_pad), jnp.float32)],
            compiler_params=pltpu.CompilerParams(
                dimension_semantics=("parallel", "arbitrary"),
            ),
            cost_estimate=cost,
        )(x_p, w_packed, b_packed)
        return out[:B, :U]

    return forward


if __name__ == "__main__":
    # Shapes from the module defaults: input_dim=784, num_piece=2, num_unit=240.
    B, D, P, U = 8, 784, 2, 240

    key = jax.random.PRNGKey(0)
    kx, kw, kb = jax.random.split(key, 3)

    # Deterministic init mimicking torch.nn.Linear (U(-1/sqrt(D), 1/sqrt(D))).
    bound = 1.0 / (D ** 0.5)
    weight = jax.random.uniform(kw, (P * U, D), jnp.float32, -bound, bound)
    bias = jax.random.uniform(kb, (P * U,), jnp.float32, -bound, bound)
    x = jax.random.normal(kx, (B, D), jnp.float32)

    # Pure-JAX reference of the PyTorch semantics (high-precision matmul).
    ref = jnp.dot(x, weight.T, precision=jax.lax.Precision.HIGHEST) + bias
    ref = ref.reshape(B, P, U).max(axis=1)

    # f32 path; block_k=256 -> multi-step D reduction exercises the accumulator.
    fwd_f32 = make_maxout(weight, bias, P, U, block_k=256)
    out = jax.block_until_ready(fwd_f32(x))
    assert out.shape == (B, U)
    assert jnp.allclose(out, ref, atol=1e-2, rtol=1e-2), \
        float(jnp.max(jnp.abs(out - ref)))

    # bf16 MXU-input variant (f32 accumulate / bias add / max), looser tolerance.
    fwd_bf16 = make_maxout(weight, bias, P, U, compute_dtype=jnp.bfloat16)
    out_bf16 = jax.block_until_ready(fwd_bf16(x)).astype(jnp.float32)
    assert out_bf16.shape == (B, U)
    assert jnp.allclose(out_bf16, ref, atol=1e-1, rtol=1e-1), \
        float(jnp.max(jnp.abs(out_bf16 - ref)))

    print("KERNEL_OK")
</pallas_src>

<mosaic_0001>
module attributes {stable_mosaic.version = 11 : i64} {
  func.func @_maxout_kernel(%arg0: i32, %arg1: i32, %arg2: memref<8x256xf32, #tpu.memory_space<vmem>>, %arg3: memref<256x512xf32, #tpu.memory_space<vmem>>, %arg4: memref<1x512xf32, #tpu.memory_space<vmem>>, %arg5: memref<8x256xf32, #tpu.memory_space<vmem>>, %arg6: memref<8x512xf32, #tpu.memory_space<vmem>>) attributes {dimension_semantics = [#tpu.dimension_semantics<parallel>, #tpu.dimension_semantics<arbitrary>], iteration_bounds = array<i64: 1, 4>, scalar_prefetch = 0 : i64, scratch_operands = 1 : i64, tpu.core_type = #tpu.core_type<tc>, window_params = [{transform_indices = @transform_0, window_bounds = array<i64: 8, 256>}, {transform_indices = @transform_1, window_bounds = array<i64: 256, 512>}, {pipeline_mode = #tpu.pipeline_mode<synchronous>, transform_indices = @transform_2, window_bounds = array<i64: 1, 512>}, {transform_indices = @transform_3, window_bounds = array<i64: 8, 256>}]} {
    %c0_i32 = arith.constant 0 : i32
    %0 = arith.cmpi eq, %arg1, %c0_i32 : i32
    %1 = arith.extui %0 : i1 to i32
    %c0_i32_0 = arith.constant 0 : i32
    %2 = arith.cmpi ne, %1, %c0_i32_0 : i32
    scf.if %2 {
      %cst_9 = arith.constant 0.000000e+00 : f32
      %12 = vector.broadcast %cst_9 : f32 to vector<8x512xf32>
      %c0_10 = arith.constant 0 : index
      %c0_11 = arith.constant 0 : index
      %13 = vector.load %arg6[%c0_10, %c0_11] : memref<8x512xf32, #tpu.memory_space<vmem>>, vector<8x512xf32>
      tpu.vector_store %arg6[%c0_10, %c0_11], %12 {strides = array<i32>} : memref<8x512xf32, #tpu.memory_space<vmem>>, vector<8x512xf32>,
    } else {
    }
    %c0 = arith.constant 0 : index
    %c0_1 = arith.constant 0 : index
    %3 = vector.load %arg6[%c0, %c0_1] : memref<8x512xf32, #tpu.memory_space<vmem>>, vector<8x512xf32>
    %c0_2 = arith.constant 0 : index
    %c0_3 = arith.constant 0 : index
    %4 = vector.load %arg2[%c0_2, %c0_3] : memref<8x256xf32, #tpu.memory_space<vmem>>, vector<8x256xf32>
    %c0_4 = arith.constant 0 : index
    %c0_5 = arith.constant 0 : index
    %5 = vector.load %arg3[%c0_4, %c0_5] : memref<256x512xf32, #tpu.memory_space<vmem>>, vector<256x512xf32>
    %cst = arith.constant dense<0.000000e+00> : vector<8x512xf32>
    %6 = tpu.matmul %4, %5, %cst {dimension_numbers = #tpu.dot_dimension_numbers<[1], [0], [0], [1], [0, 0, 1, 1], [], []>} : vector<8x256xf32>, vector<256x512xf32>, vector<8x512xf32> -> vector<8x512xf32>
    %7 = arith.addf %3, %6 : vector<8x512xf32>
    %c0_6 = arith.constant 0 : index
    %c0_7 = arith.constant 0 : index
    %8 = vector.load %arg6[%c0_6, %c0_7] : memref<8x512xf32, #tpu.memory_space<vmem>>, vector<8x512xf32>
    tpu.vector_store %arg6[%c0_6, %c0_7], %7 {strides = array<i32>} : memref<8x512xf32, #tpu.memory_space<vmem>>, vector<8x512xf32>,
    %c3_i32 = arith.constant 3 : i32
    %9 = arith.cmpi eq, %arg1, %c3_i32 : i32
    %10 = arith.extui %9 : i1 to i32
    %c0_i32_8 = arith.constant 0 : i32
    %11 = arith.cmpi ne, %10, %c0_i32_8 : i32
    scf.if %11 {
      %c0_9 = arith.constant 0 : index
      %c0_10 = arith.constant 0 : index
      %12 = vector.load %arg6[%c0_9, %c0_10] : memref<8x512xf32, #tpu.memory_space<vmem>>, vector<8x512xf32>
      %c0_11 = arith.constant 0 : index
      %c0_12 = arith.constant 0 : index
      %13 = vector.load %arg4[%c0_11, %c0_12] : memref<1x512xf32, #tpu.memory_space<vmem>>, vector<1x512xf32>
      %14 = vector.broadcast %13 : vector<1x512xf32> to vector<8x512xf32>
      %15 = arith.addf %12, %14 : vector<8x512xf32>
      %16 = vector.extract_strided_slice %15 {offsets = [0, 0], sizes = [8, 256], strides = [1, 1]} : vector<8x512xf32> to vector<8x256xf32>
      %17 = vector.extract_strided_slice %15 {offsets = [0, 256], sizes = [8, 256], strides = [1, 1]} : vector<8x512xf32> to vector<8x256xf32>
      %18 = arith.maximumf %16, %17 : vector<8x256xf32>
      %c0_13 = arith.constant 0 : index
      %c0_14 = arith.constant 0 : index
      %19 = vector.load %arg5[%c0_13, %c0_14] : memref<8x256xf32, #tpu.memory_space<vmem>>, vector<8x256xf32>
      tpu.vector_store %arg5[%c0_13, %c0_14], %18 {strides = array<i32>} : memref<8x256xf32, #tpu.memory_space<vmem>>, vector<8x256xf32>,
    } else {
    }
    return
  }
  func.func @transform_0(%arg0: i32, %arg1: i32) -> (i32, i32) {
    %c0_i32 = arith.constant 0 : i32
    return %arg0, %arg1 : i32, i32
  }
  func.func @transform_1(%arg0: i32, %arg1: i32) -> (i32, i32) {
    %c0_i32 = arith.constant 0 : i32
    %c0_i32_0 = arith.constant 0 : i32
    return %arg1, %c0_i32 : i32, i32
  }
  func.func @transform_2(%arg0: i32, %arg1: i32) -> (i32, i32) {
    %c0_i32 = arith.constant 0 : i32
    %c0_i32_0 = arith.constant 0 : i32
    %c0_i32_1 = arith.constant 0 : i32
    return %c0_i32, %c0_i32_0 : i32, i32
  }
  func.func @transform_3(%arg0: i32, %arg1: i32) -> (i32, i32) {
    %c0_i32 = arith.constant 0 : i32
    %c0_i32_0 = arith.constant 0 : i32
    return %arg0, %c0_i32 : i32, i32
  }
}

</mosaic_0001>

<bundles_post_ra>
// kernel: forward.1
= control target key start
LH: loop header
LB: loop body
LE: loop exit
PB: predicated region body
PF: predicated region fallthrough
CT: control target
= control target key end

     0   :  { %8 = vsyncpa [#allocation4], 0  ;;  %s1404_s0 = inlined_call_operand.vmem [shape: f32[8,1024], index: 0, kind: input, shape index: {}]   ;;  %s1405_s1 = inlined_call_operand.hbm [shape: f32[1024,512], index: 1, kind: input, shape index: {}]   ;;  %s1406_s2 = inlined_call_operand.hbm [shape: f32[1,512], index: 2, kind: input, shape index: {}]   ;;  %s1407_s3 = inlined_call_operand.hbm [shape: f32[8,256], index: 3, kind: output, shape index: {}]  }
   0x1   :  { %10 = vsyncpa [#allocation4 + $0x1], 0 }
   0x2   :  { %11 = vsyncpa [#allocation7], 0 }
   0x3   :  { %12 = vsyncpa [#allocation5], 0  ;;  %s1069_s12 = smov 0   ;;  %s1071_s13 = smov 0  }
   0x4   :  { %s1073_s14 = smov 0   ;;  %s1075_s15 = smov 0  }
   0x5   :  { %s1077_s16 = smov 0   ;;  %s1079_s17 = smov 0  }
   0x6 LB: > { %s674_s18 = sadd.s32 4294967295, %s1041_s17   ;;  %s65_s19 = sadd.s32 1, %s1029_s14  ;;  %s1041_s17 = sphi %s1079_s17, %s18_s17   ;;  %s1037_s16 = sphi %s1077_s16, %s1428_s16   ;;  %s1033_s15 = sphi %s1075_s15, %s1427_s15   ;;  %s1029_s14 = sphi %s1073_s14, %s1426_s14   ;;  %s1025_s13 = sphi %s1071_s13, %s1425_s13   ;;  %s1021_s12 = sphi %s1069_s12, %s1424_s12  }
   0x7   : > { %p72_p0 = scmp.ne.s32.totalorder %s1029_s14, %s1025_s13  ;;  %p73_p1 = scmp.eq.s32.totalorder %s1041_s17, 0 }
   0x8   : > { %p78_p2 = scmp.ne.s32.totalorder %s1025_s13, %s1021_s12  ;;  %p1105_p3 = scmp.eq.s32.totalorder %s674_s18, 0 }
   0x9   : > { %p74_p4 = por %p73_p1, %p72_p0  ;;  %p675_p5 = scmp.ge.s32.totalorder %s1041_s17, 1 }
   0xa   : > { %s1413_s20 = scalar_select %p1105_p3, 1, 0 }
   0xb   : > { %p1112_p6 = por %p1105_p3, %p78_p2  ;;  %p136_p7 = scmp.lt.s32.totalorder %s1041_s17, 5 }
   0xc   : > { %s1043_s23 = smov [#allocation6]   ;;  %p842_p10 = scmp.lt.s32.totalorder %s1041_s17, 4 }
   0xd   : > { %s1414_s21 = scalar_select %p1112_p6, 1, 0 }
   0xe   : > { %p1117_p8 = pnand %p675_p5, %p136_p7  ;;  %s149_s24 = sshll.u32 %s1043_s23, 4  ;;  %s150_s24 = int_to_ptr.vmem [resolvable:$true] %s149_s24 }
   0xf   : > { %s173_s25 = sand.u32 1, %s1029_s14   ;;  %p1131_p12 = pnand %p842_p10, %p74_p4 }
  0x10   : > { %s1415_s22 = scalar_select %p1117_p8, 1, 0 }
  0x11   : > { %p833_p9 = pneg %p1117_p8  ;;  %s899_s30 = scalar_lea.hbm %s1406_s2, 64 }
  0x12   : > { %s1417_s27 = scalar_select %p1131_p12, 1, 0 }
  0x13   : > { %p1127_p11 = pnand %p833_p9, %p1105_p3  ;;  %p900_p13 = scmp.ne.s32.totalorder %s1406_s2, %s899_s30 }
  0x14   : > { %p906_p5 = scmp.lt.u32.totalorder %s899_s30, %s1406_s2 }
  0x15   : > { %p901_p0 = pneg %p1127_p11 }
  0x17   : > { %p902_p1 = pnand %p901_p0, %p900_p13 }
  0x19   : > { %p903_p2 = pneg %p902_p1 }
  0x1b   : > { %p908_p4 = pnand %p906_p5, %p903_p2 }
  0x1d   : > { %911 = shalt.err (!%p908_p4)
}
  0x1e   : > { %s912_s8 = scalar_lea.vmem %s150_s24, 64  ;;  %p920_p3 = scmp.lt.s32.totalorder %s150_s24, %s150_s24 }
  0x1f   : > { %p913_p7 = scmp.ne.s32.totalorder %s150_s24, %s912_s8  ;;  %p921_p6 = scmp.lt.s32.totalorder %s912_s8, %s912_s8 }
  0x21   : > { %p915_p9 = pnand %p913_p7, %p901_p0  ;;  %p922_p8 = por %p921_p6, %p920_p3 }
  0x23   : > { %p916_p10 = pneg %p915_p9 }
  0x25   : > { %p923_p12 = pnand %p922_p8, %p916_p10 }
  0x27   : > { %926 = shalt.err (!%p923_p12)
}
  0x28   : > { %836 = dma.hbm_to_vmem [thread:$0]  (!%p1127_p11), %s1406_s2, 64, %s150_s24, [#allocation7]  }
  0x29   : > { %s27_s11 = sadd.s32 1, %s1037_s16  ;;  %s678_s12 = sshll.u32 %s173_s25, 10 }
  0x2a   : > { %p28_p13 = scmp.ge.s32.totalorder %s27_s11, 4  ;;  %s694_s23 = sshll.u32 %s1037_s16, 14 }
  0x2b   : > { %s177_s28 = scalar_lea.vmem [#allocation3], %s678_s12  ;;  %s1160_s4 = scalar_lea.hbm %s1405_s1, %s694_s23 }
  0x2c   : > { %s185_s29 = sshll.u32 %s177_s28, 4  ;;  %s1430_s11 = smov (%p28_p13, %s27_s11), 0  ;;  %s1162_s29 = int_to_ptr.vmem [resolvable:$true] %s185_s29 }
  0x2d   : > { %s62_s24 = ssub.s32 %s1037_s16, %s1430_s11  ;;  %s1172_s6 = scalar_lea.sflag [#allocation4], %s173_s25 }
  0x2e   : > { %p1166_p3 = scmp.eq.s32.totalorder %s62_s24, 0  ;;  %s927_s7 = scalar_lea.hbm %s1160_s4, 16384 }
  0x2f   : > { %p928_p6 = scmp.ne.s32.totalorder %s1160_s4, %s927_s7  ;;  %p1419_p8 = scmp.ne.s32.totalorder %s1417_s27, 0 }
  0x30   : > { %s932_s10 = scalar_lea.hbm %s1405_s1, 65536  ;;  %p933_p1 = scmp.lt.u32.totalorder %s1160_s4, %s1405_s1 }
  0x31   : > { %p929_p11 = pneg %p1419_p8  ;;  %p934_p2 = scmp.lt.u32.totalorder %s932_s10, %s927_s7 }
  0x32   : > { %p936_p4 = scmp.lt.u32.totalorder %s927_s7, %s1160_s4 }
  0x33   : > { %p930_p12 = pnand %p929_p11, %p928_p6  ;;  %p935_p5 = por %p934_p2, %p933_p1 }
  0x35   : > { %p931_p0 = pneg %p930_p12  ;;  %p937_p7 = por %p936_p4, %p935_p5 }
  0x37   : > { %p938_p9 = pnand %p937_p7, %p931_p0 }
  0x39   : > { %941 = shalt.err (!%p938_p9)
}
  0x3a   : > { %s942_s25 = scalar_lea.vmem %s1162_s29, 16384  ;;  %s1044_s28 = smov [#allocation3]  }
  0x3b   : > { %p943_p10 = scmp.ne.s32.totalorder %s1162_s29, %s942_s25  ;;  %s947_s26 = sshll.u32 %s1044_s28, 4  ;;  %s948_s26 = int_to_ptr.vmem [resolvable:$false] %s947_s26 }
  0x3c   : > { %s949_s30 = scalar_lea.vmem %s948_s26, 32768  ;;  %p950_p12 = scmp.lt.s32.totalorder %s1162_s29, %s948_s26 }
  0x3d   : > { %p945_p13 = pnand %p943_p10, %p929_p11  ;;  %p951_p1 = scmp.lt.s32.totalorder %s949_s30, %s942_s25 }
  0x3f   : > { %p946_p6 = pneg %p945_p13  ;;  %p952_p2 = por %p951_p1, %p950_p12 }
  0x41   : > { %p953_p5 = pnand %p952_p2, %p946_p6 }
  0x43   : > { %956 = shalt.err (!%p953_p5)
}
  0x44   : > { %s1045_s24 = smov 512   ;;  %s1046_s7 = smov 32  }
  0x45   : > { %840 = dma.hbm_to_vmem [thread:$0]  (!%p1419_p8), %s1160_s4, 16384, %s1162_s29, %s1172_s6, %s1045_s24, %s1045_s24, %s1046_s7  }
  0x46   : > { %s1205_s8 = scalar_select %p1166_p3, %s1029_s14, %s65_s19  }
  0x47   : > { %p1420_p11 = scmp.ne.s32.totalorder %s1415_s22, 0 }
  0x48   : > { %s199_s9 = sand.u32 (!%p1420_p11), 1, %s1025_s13   ;;  %p1421_p0 = scmp.ne.s32.totalorder (!%p1420_p11), %s1414_s21, 0 }
  0x49   : > { %197 = sbr.rel (%p1420_p11) target bundleno = 415 (0x19f), region = 32  ;;  %s683_s10 = sshll.u32 (!%p1420_p11), %s199_s9, 10 }
  0x4a   : > { %s200_s12 = scalar_lea.sflag (!%p1420_p11), [#allocation4], %s199_s9  ;;  %s1210_s23 = scalar_lea.vmem (!%p1420_p11), [#allocation3], %s683_s10 }
  0x50   : > { %1008 = dma.done.wait (%p1421_p0), %s200_s12, 16384  }
  0x51   : > { %1010 = vsyncadd (%p1421_p0), %s200_s12, 4294950912  ;;  %p1422_p8 = scmp.ne.s32.totalorder %s1413_s20, 0 }
  0x53   : > { %1012 = dma.done.wait (%p1422_p8), [#allocation7], 64  }
  0x54   : > { %1014 = vsyncadd (%p1422_p8), [#allocation7], 4294967232  ;;  %s685_s19 = sshll.u32 %s1033_s15, 1  ;;  %p687_p4 = scmp.ne.s32.totalorder %s1033_s15, 0 }
  0x55   : > { %p237_p3 = scmp.lt.s32.totalorder %s685_s19, 7  ;;  %v1047_v0 = vmov (!%p687_p4), 0.0  }
  0x56   : > { %248 = sbr.rel (%p687_p4) target bundleno = 93 (0x5d), region = 44  ;;  %249 = vst [vmem:[#allocation2] sm:$0xff] (!%p687_p4), %v1047_v0  ;;  %250 = vst [vmem:[#allocation2 + $0x8] sm:$0xff] (!%p687_p4), %v1047_v0 }
  0x57   : > { %s1432_s19 = smov (!%p237_p3, %s685_s19), 7  ;;  %251 = vst [vmem:[#allocation2 + $0x10] sm:$0xff] (!%p687_p4), %v1047_v0  ;;  %252 = vst [vmem:[#allocation2 + $0x18] sm:$0xff] (!%p687_p4), %v1047_v0 }
  0x58   : > { %s686_s22 = sshll.u32 %s1432_s19, 3 }
  0x59   : > { %s1224_s4 = scalar_lea.vmem %s1404_s0, %s686_s22 }
  0x5d PF: > { %v260_v1 = vld [vmem:[%s1210_s23 + $0x8] sm:$0xff]  ;;  %v262_v3 = vld [vmem:[%s1210_s23 + $0x18] sm:$0xff]  ;;  %v259_v6 = vld [vmem:[%s1210_s23] sm:$0xff]  ;;  %p688_p7 = scmp.ne.s32.totalorder %s1033_s15, 3 }
  0x5e   : > { %v264_v2 = vld [vmem:[%s1210_s23 + $0x28] sm:$0xff]  ;;  %v266_v5 = vld [vmem:[%s1210_s23 + $0x38] sm:$0xff]  ;;  %v263_v7 = vld [vmem:[%s1210_s23 + $0x20] sm:$0xff] }
  0x5f   : > { %v695_v4 = vpack.c.bf16 %v264_v2, %v260_v1  ;;  %v759_v8 = vpack.c.bf16 %v266_v5, %v262_v3  ;;  %v697_v9 = vpack.c.bf16 %v263_v7, %v259_v6  ;;  %v261_v10 = vld [vmem:[%s1210_s23 + $0x10] sm:$0xff]  ;;  %v268_v12 = vld [vmem:[%s1210_s23 + $0x48] sm:$0xff]  ;;  %v270_v15 = vld [vmem:[%s1210_s23 + $0x58] sm:$0xff] }
  0x60   : > { %v265_v11 = vld [vmem:[%s1210_s23 + $0x30] sm:$0xff]  ;;  %v272_v14 = vld [vmem:[%s1210_s23 + $0x68] sm:$0xff]  ;;  %v274_v16 = vld [vmem:[%s1210_s23 + $0x78] sm:$0xff] }
  0x61   : > { %696 = vmatprep.subr.bf16.mxu0 %v695_v4  ;;  %v761_v13 = vpack.c.bf16 %v265_v11, %v261_v10  ;;  %760 = vmatprep.subr.bf16.mxu1 %v759_v8  ;;  %v699_v17 = vpack.c.bf16 %v272_v14, %v268_v12  ;;  %v763_v18 = vpack.c.bf16 %v274_v16, %v270_v15  ;;  %v267_v19 = vld [vmem:[%s1210_s23 + $0x40] sm:$0xff]  ;;  %v269_v21 = vld [vmem:[%s1210_s23 + $0x50] sm:$0xff]  ;;  %v276_v24 = vld [vmem:[%s1210_s23 + $0x88] sm:$0xff] }
  0x62   : > { %698 = vmatpush1.bf16.msra.mxu0 %v697_v9  ;;  %v271_v20 = vld [vmem:[%s1210_s23 + $0x60] sm:$0xff]  ;;  %v273_v23 = vld [vmem:[%s1210_s23 + $0x70] sm:$0xff]  ;;  %v280_v25 = vld [vmem:[%s1210_s23 + $0xa8] sm:$0xff] }
  0x63   : > { %762 = vmatpush1.bf16.msra.mxu1 %v761_v13  ;;  %v701_v22 = vpack.c.bf16 %v271_v20, %v267_v19  ;;  %700 = vmatprep.subr.bf16.mxu0 %v699_v17  ;;  %v765_v26 = vpack.c.bf16 %v273_v23, %v269_v21  ;;  %v703_v27 = vpack.c.bf16 %v280_v25, %v276_v24  ;;  %v278_v28 = vld [vmem:[%s1210_s23 + $0x98] sm:$0xff]  ;;  %v275_v30 = vld [vmem:[%s1210_s23 + $0x80] sm:$0xff]  ;;  %v277_v33 = vld [vmem:[%s1210_s23 + $0x90] sm:$0xff] }
  0x64   : > { %764 = vmatprep.subr.bf16.mxu1 %v763_v18  ;;  %v282_v29 = vld [vmem:[%s1210_s23 + $0xb8] sm:$0xff]  ;;  %v279_v32 = vld [vmem:[%s1210_s23 + $0xa0] sm:$0xff]  ;;  %v281_v34 = vld [vmem:[%s1210_s23 + $0xb0] sm:$0xff] }
  0x65   : > { %v767_v31 = vpack.c.bf16 %v282_v29, %v278_v28  ;;  %v705_v35 = vpack.c.bf16 %v279_v32, %v275_v30  ;;  %v284_v36 = vld [vmem:[%s1210_s23 + $0xc8] sm:$0xff]  ;;  %v286_v38 = vld [vmem:[%s1210_s23 + $0xd8] sm:$0xff]  ;;  %v769_v39 = vpack.c.bf16 %v281_v34, %v277_v33  ;;  %v283_v42 = vld [vmem:[%s1210_s23 + $0xc0] sm:$0xff] }
  0x66   : > { %702 = vmatpush1.bf16.msra.mxu0 %v701_v22  ;;  %v288_v37 = vld [vmem:[%s1210_s23 + $0xe8] sm:$0xff]  ;;  %v290_v41 = vld [vmem:[%s1210_s23 + $0xf8] sm:$0xff]  ;;  %v287_v43 = vld [vmem:[%s1210_s23 + $0xe0] sm:$0xff] }
  0x67   : > { %766 = vmatpush1.bf16.msra.mxu1 %v765_v26  ;;  %704 = vmatprep.subr.bf16.mxu0 %v703_v27  ;;  %v707_v40 = vpack.c.bf16 %v288_v37, %v284_v36  ;;  %v771_v44 = vpack.c.bf16 %v290_v41, %v286_v38  ;;  %v285_v45 = vld [vmem:[%s1210_s23 + $0xd0] sm:$0xff]  ;;  %v292_v47 = vld [vmem:[%s1210_s23 + $0x108] sm:$0xff]  ;;  %v294_v49 = vld [vmem:[%s1210_s23 + $0x118] sm:$0xff]  ;;  %v709_v51 = vpack.c.bf16 %v287_v43, %v283_v42 }
  0x68   : > { %768 = vmatprep.subr.bf16.mxu1 %v767_v31  ;;  %v289_v46 = vld [vmem:[%s1210_s23 + $0xf0] sm:$0xff]  ;;  %v296_v48 = vld [vmem:[%s1210_s23 + $0x128] sm:$0xff]  ;;  %v298_v50 = vld [vmem:[%s1210_s23 + $0x138] sm:$0xff] }
  0x69   : > { %v773_v52 = vpack.c.bf16 %v289_v46, %v285_v45  ;;  %v711_v53 = vpack.c.bf16 %v296_v48, %v292_v47  ;;  %v291_v54 = vld [vmem:[%s1210_s23 + $0x100] sm:$0xff]  ;;  %v293_v56 = vld [vmem:[%s1210_s23 + $0x110] sm:$0xff]  ;;  %v775_v57 = vpack.c.bf16 %v298_v50, %v294_v49  ;;  %v300_v59 = vld [vmem:[%s1210_s23 + $0x148] sm:$0xff] }
  0x6a   : > { %706 = vmatpush1.bf16.msra.mxu0 %v705_v35  ;;  %v295_v55 = vld [vmem:[%s1210_s23 + $0x120] sm:$0xff]  ;;  %v297_v58 = vld [vmem:[%s1210_s23 + $0x130] sm:$0xff]  ;;  %v304_v60 = vld [vmem:[%s1210_s23 + $0x168] sm:$0xff] }
  0x6b   : > { %770 = vmatpush1.bf16.msra.mxu1 %v769_v39  ;;  %708 = vmatprep.subr.bf16.mxu0 %v707_v40  ;;  %v302_v61 = vld [vmem:[%s1210_s23 + $0x158] sm:$0xff]  ;;  %v713_v63 = vpack.c.bf16 %v295_v55, %v291_v54  ;;  %v777_v0 = vpack.c.bf16 %v297_v58, %v293_v56  ;;  %v715_v1 = vpack.c.bf16 %v304_v60, %v300_v59  ;;  %v299_v2 = vld [vmem:[%s1210_s23 + $0x140] sm:$0xff]  ;;  %v301_v4 = vld [vmem:[%s1210_s23 + $0x150] sm:$0xff] }
  0x6c   : > { %772 = vmatprep.subr.bf16.mxu1 %v771_v44  ;;  %v306_v62 = vld [vmem:[%s1210_s23 + $0x178] sm:$0xff]  ;;  %v303_v3 = vld [vmem:[%s1210_s23 + $0x160] sm:$0xff]  ;;  %v305_v6 = vld [vmem:[%s1210_s23 + $0x170] sm:$0xff] }
  0x6d   : > { %v779_v5 = vpack.c.bf16 %v306_v62, %v302_v61  ;;  %v308_v7 = vld [vmem:[%s1210_s23 + $0x188] sm:$0xff]  ;;  %v310_v9 = vld [vmem:[%s1210_s23 + $0x198] sm:$0xff]  ;;  %v717_v11 = vpack.c.bf16 %v303_v3, %v299_v2  ;;  %v781_v12 = vpack.c.bf16 %v305_v6, %v301_v4  ;;  %v307_v14 = vld [vmem:[%s1210_s23 + $0x180] sm:$0xff] }
  0x6e   : > { %710 = vmatpush1.bf16.msra.mxu0 %v709_v51  ;;  %v312_v8 = vld [vmem:[%s1210_s23 + $0x1a8] sm:$0xff]  ;;  %v314_v10 = vld [vmem:[%s1210_s23 + $0x1b8] sm:$0xff]  ;;  %v311_v15 = vld [vmem:[%s1210_s23 + $0x1a0] sm:$0xff] }
  0x6f   : > { %774 = vmatpush1.bf16.msra.mxu1 %v773_v52  ;;  %712 = vmatprep.subr.bf16.mxu0 %v711_v53  ;;  %v719_v13 = vpack.c.bf16 %v312_v8, %v308_v7  ;;  %v309_v16 = vld [vmem:[%s1210_s23 + $0x190] sm:$0xff]  ;;  %v783_v17 = vpack.c.bf16 %v314_v10, %v310_v9  ;;  %v316_v19 = vld [vmem:[%s1210_s23 + $0x1c8] sm:$0xff]  ;;  %v318_v21 = vld [vmem:[%s1210_s23 + $0x1d8] sm:$0xff]  ;;  %v721_v23 = vpack.c.bf16 %v311_v15, %v307_v14 }
  0x70   : > { %776 = vmatprep.subr.bf16.mxu1 %v775_v57  ;;  %v313_v18 = vld [vmem:[%s1210_s23 + $0x1b0] sm:$0xff]  ;;  %v320_v20 = vld [vmem:[%s1210_s23 + $0x1e8] sm:$0xff]  ;;  %v322_v22 = vld [vmem:[%s1210_s23 + $0x1f8] sm:$0xff] }
  0x71   : > { %v785_v24 = vpack.c.bf16 %v313_v18, %v309_v16  ;;  %v723_v25 = vpack.c.bf16 %v320_v20, %v316_v19  ;;  %v315_v26 = vld [vmem:[%s1210_s23 + $0x1c0] sm:$0xff]  ;;  %v317_v28 = vld [vmem:[%s1210_s23 + $0x1d0] sm:$0xff]  ;;  %v787_v29 = vpack.c.bf16 %v322_v22, %v318_v21  ;;  %v324_v31 = vld [vmem:[%s1210_s23 + $0x208] sm:$0xff] }
  0x72   : > { %714 = vmatpush1.bf16.msra.mxu0 %v713_v63  ;;  %v319_v27 = vld [vmem:[%s1210_s23 + $0x1e0] sm:$0xff]  ;;  %v321_v30 = vld [vmem:[%s1210_s23 + $0x1f0] sm:$0xff]  ;;  %v328_v32 = vld [vmem:[%s1210_s23 + $0x228] sm:$0xff] }
  0x73   : > { %778 = vmatpush1.bf16.msra.mxu1 %v777_v0  ;;  %716 = vmatprep.subr.bf16.mxu0 %v715_v1  ;;  %v326_v33 = vld [vmem:[%s1210_s23 + $0x218] sm:$0xff]  ;;  %v725_v35 = vpack.c.bf16 %v319_v27, %v315_v26  ;;  %v789_v36 = vpack.c.bf16 %v321_v30, %v317_v28  ;;  %v727_v37 = vpack.c.bf16 %v328_v32, %v324_v31  ;;  %v323_v38 = vld [vmem:[%s1210_s23 + $0x200] sm:$0xff]  ;;  %v325_v40 = vld [vmem:[%s1210_s23 + $0x210] sm:$0xff] }
  0x74   : > { %780 = vmatprep.subr.bf16.mxu1 %v779_v5  ;;  %v330_v34 = vld [vmem:[%s1210_s23 + $0x238] sm:$0xff]  ;;  %v327_v39 = vld [vmem:[%s1210_s23 + $0x220] sm:$0xff]  ;;  %v329_v42 = vld [vmem:[%s1210_s23 + $0x230] sm:$0xff] }
  0x75   : > { %v791_v41 = vpack.c.bf16 %v330_v34, %v326_v33  ;;  %v332_v43 = vld [vmem:[%s1210_s23 + $0x248] sm:$0xff]  ;;  %v334_v45 = vld [vmem:[%s1210_s23 + $0x258] sm:$0xff]  ;;  %v729_v47 = vpack.c.bf16 %v327_v39, %v323_v38  ;;  %v793_v48 = vpack.c.bf16 %v329_v42, %v325_v40  ;;  %v331_v50 = vld [vmem:[%s1210_s23 + $0x240] sm:$0xff] }
  0x76   : > { %718 = vmatpush1.bf16.msra.mxu0 %v717_v11  ;;  %v336_v44 = vld [vmem:[%s1210_s23 + $0x268] sm:$0xff]  ;;  %v338_v46 = vld [vmem:[%s1210_s23 + $0x278] sm:$0xff]  ;;  %v335_v51 = vld [vmem:[%s1210_s23 + $0x260] sm:$0xff] }
  0x77   : > { %782 = vmatpush1.bf16.msra.mxu1 %v781_v12  ;;  %720 = vmatprep.subr.bf16.mxu0 %v719_v13  ;;  %v731_v49 = vpack.c.bf16 %v336_v44, %v332_v43  ;;  %v333_v52 = vld [vmem:[%s1210_s23 + $0x250] sm:$0xff]  ;;  %v795_v53 = vpack.c.bf16 %v338_v46, %v334_v45  ;;  %v340_v55 = vld [vmem:[%s1210_s23 + $0x288] sm:$0xff]  ;;  %v342_v57 = vld [vmem:[%s1210_s23 + $0x298] sm:$0xff]  ;;  %v733_v59 = vpack.c.bf16 %v335_v51, %v331_v50 }
  0x78   : > { %784 = vmatprep.subr.bf16.mxu1 %v783_v17  ;;  %v337_v54 = vld [vmem:[%s1210_s23 + $0x270] sm:$0xff]  ;;  %v344_v56 = vld [vmem:[%s1210_s23 + $0x2a8] sm:$0xff]  ;;  %v346_v58 = vld [vmem:[%s1210_s23 + $0x2b8] sm:$0xff] }
  0x79   : > { %v797_v60 = vpack.c.bf16 %v337_v54, %v333_v52  ;;  %v735_v61 = vpack.c.bf16 %v344_v56, %v340_v55  ;;  %v339_v62 = vld [vmem:[%s1210_s23 + $0x280] sm:$0xff]  ;;  %v341_v0 = vld [vmem:[%s1210_s23 + $0x290] sm:$0xff]  ;;  %v799_v1 = vpack.c.bf16 %v346_v58, %v342_v57  ;;  %v348_v3 = vld [vmem:[%s1210_s23 + $0x2c8] sm:$0xff] }
  0x7a   : > { %722 = vmatpush1.bf16.msra.mxu0 %v721_v23  ;;  %v343_v63 = vld [vmem:[%s1210_s23 + $0x2a0] sm:$0xff]  ;;  %v345_v2 = vld [vmem:[%s1210_s23 + $0x2b0] sm:$0xff]  ;;  %v352_v4 = vld [vmem:[%s1210_s23 + $0x2e8] sm:$0xff] }
  0x7b   : > { %786 = vmatpush1.bf16.msra.mxu1 %v785_v24  ;;  %724 = vmatprep.subr.bf16.mxu0 %v723_v25  ;;  %v350_v5 = vld [vmem:[%s1210_s23 + $0x2d8] sm:$0xff]  ;;  %v737_v7 = vpack.c.bf16 %v343_v63, %v339_v62  ;;  %v347_v8 = vld [vmem:[%s1210_s23 + $0x2c0] sm:$0xff]  ;;  %v801_v9 = vpack.c.bf16 %v345_v2, %v341_v0  ;;  %v739_v10 = vpack.c.bf16 %v352_v4, %v348_v3  ;;  %v349_v12 = vld [vmem:[%s1210_s23 + $0x2d0] sm:$0xff] }
  0x7c   : > { %788 = vmatprep.subr.bf16.mxu1 %v787_v29  ;;  %v354_v6 = vld [vmem:[%s1210_s23 + $0x2f8] sm:$0xff]  ;;  %v351_v11 = vld [vmem:[%s1210_s23 + $0x2e0] sm:$0xff]  ;;  %v353_v13 = vld [vmem:[%s1210_s23 + $0x2f0] sm:$0xff] }
  0x7d   : > { %v803_v14 = vpack.c.bf16 %v354_v6, %v350_v5  ;;  %v356_v15 = vld [vmem:[%s1210_s23 + $0x308] sm:$0xff]  ;;  %v358_v18 = vld [vmem:[%s1210_s23 + $0x318] sm:$0xff]  ;;  %v741_v20 = vpack.c.bf16 %v351_v11, %v347_v8  ;;  %v805_v21 = vpack.c.bf16 %v353_v13, %v349_v12  ;;  %v355_v23 = vld [vmem:[%s1210_s23 + $0x300] sm:$0xff] }
  0x7e   : > { %726 = vmatpush1.bf16.msra.mxu0 %v725_v35  ;;  %v360_v16 = vld [vmem:[%s1210_s23 + $0x328] sm:$0xff]  ;;  %v362_v19 = vld [vmem:[%s1210_s23 + $0x338] sm:$0xff]  ;;  %v359_v24 = vld [vmem:[%s1210_s23 + $0x320] sm:$0xff] }
  0x7f   : > { %790 = vmatpush1.bf16.msra.mxu1 %v789_v36  ;;  %728 = vmatprep.subr.bf16.mxu0 %v727_v37  ;;  %v258_v17 = vld [vmem:[%s1224_s4 + $0x8] sm:$0xff]  ;;  %v743_v22 = vpack.c.bf16 %v360_v16, %v356_v15  ;;  %v357_v25 = vld [vmem:[%s1210_s23 + $0x310] sm:$0xff]  ;;  %v807_v26 = vpack.c.bf16 %v362_v19, %v358_v18  ;;  %v366_v30 = vld [vmem:[%s1210_s23 + $0x358] sm:$0xff]  ;;  %v745_v32 = vpack.c.bf16 %v359_v24, %v355_v23  ;;  %v547_v15 = vlaneseq (!%p688_p7) }
  0x80   : > { %792 = vmatprep.subr.bf16.mxu1 %v791_v41  ;;  %451 = vmatprep.mubr.f32.mxu0 %v258_v17  ;;  %v361_v27 = vld [vmem:[%s1210_s23 + $0x330] sm:$0xff]  ;;  %v364_v28 = vld [vmem:[%s1210_s23 + $0x348] sm:$0xff]  ;;  %v370_v31 = vld [vmem:[%s1210_s23 + $0x378] sm:$0xff] }
  0x81   : > { %522 = vmatprep.mubr.f32.mxu1 %v258_v17  ;;  %v368_v29 = vld [vmem:[%s1210_s23 + $0x368] sm:$0xff]  ;;  %v809_v33 = vpack.c.bf16 %v361_v27, %v357_v25  ;;  %v363_v35 = vld [vmem:[%s1210_s23 + $0x340] sm:$0xff]  ;;  %v365_v37 = vld [vmem:[%s1210_s23 + $0x350] sm:$0xff]  ;;  %v811_v38 = vpack.c.bf16 %v370_v31, %v366_v30  ;;  %v548_v16 = vshrl.u32 (!%p688_p7), %v547_v15, 7 }
  0x82   : > { %730 = vmatpush1.bf16.msra.mxu0 %v729_v47  ;;  %v747_v34 = vpack.c.bf16 %v368_v29, %v364_v28  ;;  %v367_v36 = vld [vmem:[%s1210_s23 + $0x360] sm:$0xff]  ;;  %v369_v39 = vld [vmem:[%s1210_s23 + $0x370] sm:$0xff]  ;;  %v372_v40 = vld [vmem:[%s1210_s23 + $0x388] sm:$0xff] }
  0x83   : > { %794 = vmatpush1.bf16.msra.mxu1 %v793_v48  ;;  %732 = vmatprep.subr.bf16.mxu0 %v731_v49  ;;  %v376_v41 = vld [vmem:[%s1210_s23 + $0x3a8] sm:$0xff]  ;;  %v374_v42 = vld [vmem:[%s1210_s23 + $0x398] sm:$0xff]  ;;  %v749_v44 = vpack.c.bf16 %v367_v36, %v363_v35  ;;  %v813_v45 = vpack.c.bf16 %v369_v39, %v365_v37  ;;  %v371_v47 = vld [vmem:[%s1210_s23 + $0x380] sm:$0xff]  ;;  %v549_v19 = vsub.s32 (!%p688_p7), 0, %v548_v16 }
  0x84   : > { %796 = vmatprep.subr.bf16.mxu1 %v795_v53  ;;  %v378_v43 = vld [vmem:[%s1210_s23 + $0x3b8] sm:$0xff]  ;;  %v751_v46 = vpack.c.bf16 %v376_v41, %v372_v40  ;;  %v375_v48 = vld [vmem:[%s1210_s23 + $0x3a0] sm:$0xff]  ;;  %v373_v49 = vld [vmem:[%s1210_s23 + $0x390] sm:$0xff] }
  0x85   : > { %v815_v50 = vpack.c.bf16 %v378_v43, %v374_v42  ;;  %v377_v51 = vld [vmem:[%s1210_s23 + $0x3b0] sm:$0xff]  ;;  %v380_v52 = vld [vmem:[%s1210_s23 + $0x3c8] sm:$0xff]  ;;  %v382_v54 = vld [vmem:[%s1210_s23 + $0x3d8] sm:$0xff]  ;;  %v753_v56 = vpack.c.bf16 %v375_v48, %v371_v47 }
  0x86   : > { %734 = vmatpush1.bf16.msra.mxu0 %v733_v59  ;;  %v384_v53 = vld [vmem:[%s1210_s23 + $0x3e8] sm:$0xff]  ;;  %v386_v55 = vld [vmem:[%s1210_s23 + $0x3f8] sm:$0xff]  ;;  %v817_v57 = vpack.c.bf16 %v377_v51, %v373_v49  ;;  %v379_v59 = vld [vmem:[%s1210_s23 + $0x3c0] sm:$0xff] }
  0x87   : > { %798 = vmatpush1.bf16.msra.mxu1 %v797_v60  ;;  %736 = vmatprep.subr.bf16.mxu0 %v735_v61  ;;  %v755_v58 = vpack.c.bf16 %v384_v53, %v380_v52  ;;  %v383_v60 = vld [vmem:[%s1210_s23 + $0x3e0] sm:$0xff]  ;;  %v819_v61 = vpack.c.bf16 %v386_v55, %v382_v54  ;;  %v381_v62 = vld [vmem:[%s1210_s23 + $0x3d0] sm:$0xff]  ;;  %v254_v5 = vld [vmem:[#allocation2 + $0x8] sm:$0xff] }
  0x88   : > { %800 = vmatprep.subr.bf16.mxu1 %v799_v1  ;;  %v385_v63 = vld [vmem:[%s1210_s23 + $0x3f0] sm:$0xff]  ;;  %v757_v0 = vpack.c.bf16 %v383_v60, %v379_v59  ;;  %v257_v2 = vld [vmem:[%s1224_s4] sm:$0xff] }
  0x89   : > { %v821_v1 = vpack.c.bf16 %v385_v63, %v381_v62  ;;  %v253_v3 = vld [vmem:[#allocation2] sm:$0xff]  ;;  %v255_v4 = vld [vmem:[#allocation2 + $0x10] sm:$0xff] }
  0x8a   : > { %738 = vmatpush1.bf16.msra.mxu0 %v737_v7  ;;  %v256_v7 = vld [vmem:[#allocation2 + $0x18] sm:$0xff]  ;;  %v545_v17 = vld [vmem:[#allocation6] sm:$0xf] (!%p688_p7) }
  0x8b   : > { %802 = vmatpush1.bf16.msra.mxu1 %v801_v9  ;;  %740 = vmatprep.subr.bf16.mxu0 %v739_v10 }
  0x8c   : > { %804 = vmatprep.subr.bf16.mxu1 %v803_v14 }
  0x8e   : > { %742 = vmatpush1.bf16.msra.mxu0 %v741_v20  ;;  %v557_v20 = vsub.s32 (!%p688_p7), 2, %v548_v16 }
  0x8f   : > { %806 = vmatpush1.bf16.msra.mxu1 %v805_v21  ;;  %744 = vmatprep.subr.bf16.mxu0 %v743_v22  ;;  %v553_v21 = vsub.s32 (!%p688_p7), 1, %v548_v16  ;;  %v561_v22 = vsub.s32 (!%p688_p7), 3, %v548_v16 }
  0x90   : > { %808 = vmatprep.subr.bf16.mxu1 %v807_v26  ;;  %v550_v26 = vrot.slane (!%p688_p7), %v545_v17, %v549_v19  ;;  %v558_v27 = vrot.slane (!%p688_p7), %v545_v17, %v557_v20 }
  0x91   : > { %v554_v28 = vrot.slane (!%p688_p7), %v545_v17, %v553_v21  ;;  %v562_v29 = vrot.slane (!%p688_p7), %v545_v17, %v561_v22 }
  0x92   : > { %746 = vmatpush1.bf16.msra.mxu0 %v745_v32 }
  0x93   : > { %810 = vmatpush1.bf16.msra.mxu1 %v809_v33  ;;  %748 = vmatprep.subr.bf16.mxu0 %v747_v34 }
  0x94   : > { %812 = vmatprep.subr.bf16.mxu1 %v811_v38 }
  0x96   : > { %750 = vmatpush1.bf16.msra.mxu0 %v749_v44 }
  0x97   : > { %814 = vmatpush1.bf16.msra.mxu1 %v813_v45  ;;  %752 = vmatprep.subr.bf16.mxu0 %v751_v46 }
  0x98   : > { %816 = vmatprep.subr.bf16.mxu1 %v815_v50 }
  0x9a   : > { %754 = vmatpush1.bf16.msra.mxu0 %v753_v56 }
  0x9b   : > { %818 = vmatpush1.bf16.msra.mxu1 %v817_v57  ;;  %756 = vmatprep.subr.bf16.mxu0 %v755_v58 }
  0x9c   : > { %820 = vmatprep.subr.bf16.mxu1 %v819_v61 }
  0x9e   : > { %758 = vmatpush1.bf16.msra.mxu0 %v757_v0 }
  0x9f   : > { %822 = vmatpush1.bf16.msra.mxu1 %v821_v1 }
  0xa1   : > { %452 = vmatmul.mubr.f32.vlgmr.msra.gmra.mrb[0].mxu0 %v257_v2 }
  0xa2   : > { %523 = vmatmul.mubr.f32.vlgmr.msra.gmra.mrb[0].mxu1 %v257_v2 }
 0x173   : > { %540 = sbr.rel (%p688_p7) target bundleno = 390 (0x186), region = 48 }
 0x174   : > { %v453_v6 = vpop.f32.mrb[0].mxu0 }
 0x175   : > { %v529_v8 = vadd.f32 %v453_v6, %v253_v3  ;;  %v524_v9 = vpop.f32.mrb[0].mxu1  ;;  %v455_v10 = vpop.f32.mrb[1].mxu0 }
 0x176   : > { %v531_v11 = vadd.f32 %v524_v9, %v255_v4  ;;  %v530_v12 = vadd.f32 %v455_v10, %v254_v5  ;;  %v526_v13 = vpop.f32.mrb[1].mxu1 }
 0x177   : > { %533 = vst [vmem:[#allocation2] sm:$0xff] %v529_v8  ;;  %v532_v14 = vadd.f32 %v526_v13, %v256_v7 }
 0x178   : > { %535 = vst [vmem:[#allocation2 + $0x10] sm:$0xff] %v531_v11  ;;  %534 = vst [vmem:[#allocation2 + $0x8] sm:$0xff] %v530_v12 }
 0x179   : > { %536 = vst [vmem:[#allocation2 + $0x18] sm:$0xff] %v532_v14 }
 0x17e   : > { %v541_v18 = vld [vmem:[#allocation2] sm:$0xff] }
 0x17f   : > { %v543_v23 = vld [vmem:[#allocation2 + $0x10] sm:$0xff]  ;;  %v542_v24 = vld [vmem:[#allocation2 + $0x8] sm:$0xff]  ;;  %v567_v30 = vadd.f32 %v550_v26, %v541_v18 }
 0x180   : > { %v544_v25 = vld [vmem:[#allocation2 + $0x18] sm:$0xff]  ;;  %v569_v31 = vadd.f32 %v558_v27, %v543_v23  ;;  %v568_v32 = vadd.f32 %v554_v28, %v542_v24 }
 0x181   : > { %v570_v33 = vadd.f32 %v562_v29, %v544_v25 }
 0x182   : > { %v571_v34 = vmax.f32 %v567_v30, %v569_v31 }
 0x183   : > { %v572_v35 = vmax.f32 %v568_v32, %v570_v33 }
 0x184   : > { %573 = vst [vmem:[#allocation8] sm:$0xff] %v571_v34 }
 0x185   : > { %574 = vst [vmem:[#allocation8 + $0x8] sm:$0xff] %v572_v35 }
 0x186 PF: > { %p1360_p9 = scmp.eq.s32.totalorder %s674_s18, 3  ;;  %s1048_s20 = smov [#allocation8]  }
 0x187   : > { %s585_s21 = sshll.u32 %s1048_s20, 4  ;;  %s586_s21 = int_to_ptr.vmem [resolvable:$true] %s585_s21 }
 0x188   : > { %s957_s5 = scalar_lea.vmem %s586_s21, 256  ;;  %p964_p12 = scmp.lt.s32.totalorder %s586_s21, %s586_s21 }
 0x189   : > { %p958_p10 = scmp.ne.s32.totalorder %s586_s21, %s957_s5  ;;  %p965_p1 = scmp.lt.s32.totalorder %s957_s5, %s957_s5 }
 0x18b   : > { %p959_p13 = pnand %p958_p10, %p1360_p9  ;;  %p966_p2 = por %p965_p1, %p964_p12 }
 0x18d   : > { %p960_p6 = pneg %p959_p13 }
 0x18f   : > { %p967_p5 = pnand %p966_p2, %p960_p6 }
 0x191   : > { %970 = shalt.err (!%p967_p5)
}
 0x192   : > { %s971_s18 = scalar_lea.hbm %s1407_s3, 256 }
 0x193   : > { %p972_p11 = scmp.ne.s32.totalorder %s1407_s3, %s971_s18  ;;  %p977_p3 = scmp.lt.u32.totalorder %s971_s18, %s1407_s3 }
 0x195   : > { %p973_p0 = pnand %p972_p11, %p1360_p9 }
 0x197   : > { %p974_p8 = pneg %p973_p0 }
 0x199   : > { %p979_p4 = pnand %p977_p3, %p974_p8 }
 0x19b   : > { %982 = shalt.err (!%p979_p4)
}
 0x19c   : > { %830 = dma.vmem_to_hbm [thread:$0]  (%p1360_p9), %s586_s21, 256, %s1407_s3, [#allocation5]  }
 0x19d   : > { %1016 = dma.done.wait (%p1360_p9), [#allocation5], 256  }
 0x19e   : > { %1018 = vsyncadd (%p1360_p9), [#allocation5], 4294967040 }
 0x19f PF: > { %s18_s17 = sadd.s32 1, %s1041_s17   ;;  %s1424_s12 = smov %s1025_s13 }
 0x1a0   : > { %p15_p7 = scmp.ge.s32.totalorder %s18_s17, 6   ;;  %s1425_s13 = smov %s1029_s14 }
 0x1a1   : > { %s1426_s14 = smov %s1205_s8  ;;  %s1427_s15 = smov %s1037_s16 }
 0x1a2   : > { %s1428_s16 = smov %s1430_s11  ;;  %17 = sbr.rel (!%p15_p7) target bundleno = 6 (0x6), region = 85 }
 0x1a9   :  { %598 = vsyncpa [#allocation4], 1 }
 0x1aa   :  { %600 = vsyncpa [#allocation4 + $0x1], 1 }
 0x1ab   :  { %601 = vsyncpa [#allocation7], 1 }
 0x1ac   :  { %602 = vsyncpa [#allocation5], 1 }
 0x1ad   :  { %604 = vsyncpa [#allocation5 + $0x1], 1 }

</bundles_post_ra>
